<compile_context>
chip_gen: v6e
topology: v6e:2x2x1
jax: 0.10.0
libtpu: 0.0.40
codegen_flags: <defaults>
</compile_context>

<pallas_src>
import functools

import jax
import jax.numpy as jnp
from jax.experimental import pallas as pl
from jax.experimental.pallas import tpu as pltpu

_LANES = 128
_MAX_BLOCK_ROWS = 2048  # 2048 x 128 f32 = 1 MiB per input block


def _fused_kernel(x_ref, t_ref, p_ref, o_ref, acc_d, acc_p, *, n_xb, n_pb):
    """Accumulate sum((x-t)^2) and sum(p^2) into VMEM vector accumulators.

    Only the last grid step does the full reduce and writes the two scalars
    to the SMEM output (o_ref[0,0] = sum sq diff, o_ref[0,1] = sum sq params).
    """
    i = pl.program_id(0)

    @pl.when(i == 0)
    def _():
        acc_d[...] = jnp.zeros_like(acc_d)
        acc_p[...] = jnp.zeros_like(acc_p)

    # MSE partial: only for grid steps that map to real x/target blocks.
    @pl.when(i < n_xb)
    def _():
        d = x_ref[...].astype(jnp.float32) - t_ref[...].astype(jnp.float32)
        acc_d[...] += d * d

    # L2 partial: only for grid steps that map to real parameter blocks.
    @pl.when(i < n_pb)
    def _():
        pv = p_ref[...].astype(jnp.float32)
        acc_p[...] += pv * pv

    @pl.when(i == pl.num_programs(0) - 1)
    def _():
        o_ref[0, 0] = jnp.sum(acc_d[...])
        o_ref[0, 1] = jnp.sum(acc_p[...])


def _to_slab(flat):
    """Reshape a flat f32 array to (n_blocks*block_rows, 128), tail-padded only.

    Returns (slab_2d, n_blocks, block_rows).  block_rows is a multiple of 8
    (sublane tiling) and capped at _MAX_BLOCK_ROWS.
    """
    n = flat.shape[0]
    rows = -(-n // _LANES)                       # ceil
    rows8 = max(8, -(-rows // 8) * 8)            # round rows up to multiple of 8
    block_rows = min(_MAX_BLOCK_ROWS, rows8)
    n_blocks = -(-rows8 // block_rows)
    padded_rows = n_blocks * block_rows
    padded_n = padded_rows * _LANES
    if padded_n != n:
        flat = jnp.pad(flat, (0, padded_n - n))  # zero-pad only the tail
    return flat.reshape(padded_rows, _LANES), n_blocks, block_rows


@jax.jit
def _fused_sums(x_flat, t_flat, p_flat):
    """Returns (sum((x-t)^2), sum(p^2)) via one fused pallas_call."""
    x2d, n_xb, brx = _to_slab(x_flat)
    t2d, _, _ = _to_slab(t_flat)
    p2d, n_pb, brp = _to_slab(p_flat)
    max_blocks = max(n_xb, n_pb)

    kernel = functools.partial(_fused_kernel, n_xb=n_xb, n_pb=n_pb)

    out = pl.pallas_call(
        kernel,
        out_shape=jax.ShapeDtypeStruct((1, 2), jnp.float32),
        grid_spec=pltpu.PrefetchScalarGridSpec(
            num_scalar_prefetch=0,
            grid=(max_blocks,),
            in_specs=[
                # Clamp the block index so grid steps past a slab's extent
                # just re-see its last block (contribution is pl.when-gated).
                pl.BlockSpec((brx, _LANES),
                             lambda i: (jnp.minimum(i, n_xb - 1), 0)),
                pl.BlockSpec((brx, _LANES),
                             lambda i: (jnp.minimum(i, n_xb - 1), 0)),
                pl.BlockSpec((brp, _LANES),
                             lambda i: (jnp.minimum(i, n_pb - 1), 0)),
            ],
            out_specs=pl.BlockSpec((1, 2), lambda i: (0, 0),
                                   memory_space=pltpu.SMEM),
            scratch_shapes=[
                pltpu.VMEM((brx, _LANES), jnp.float32),  # acc for (x-t)^2
                pltpu.VMEM((brp, _LANES), jnp.float32),  # acc for p^2
            ],
        ),
        compiler_params=pltpu.CompilerParams(
            # Accumulators are loop-carried across the grid -> "arbitrary".
            dimension_semantics=("arbitrary",),
            # Explicit VMEM budget (safe on v5e/v6e/v7x): ~8 MiB worst case
            # for 3 double-buffered 1 MiB inputs + 2 accumulators.
            vmem_limit_bytes=32 * 1024 * 1024,
        ),
    )(x2d, t2d, p2d)
    return out[0, 0], out[0, 1]


def l2_reg_loss(x, target, params, lam=0.01):
    """loss = mean((x - target)^2) + lam * sum_p sum(p^2)."""
    x_flat = x.reshape(-1).astype(jnp.float32)
    t_flat = target.reshape(-1).astype(jnp.float32)
    # Flattened parameter slab for the L2 penalty (tiny; a single concat).
    p_flat = jnp.concatenate(
        [p.reshape(-1).astype(jnp.float32) for p in params])

    n_elem = 1
    for d in x.shape:
        n_elem *= d

    sq_diff, sq_params = _fused_sums(x_flat, t_flat, p_flat)
    mse = sq_diff / jnp.float32(n_elem)          # nn.MSELoss default = mean
    return mse + jnp.float32(lam) * sq_params


if __name__ == "__main__":
    key = jax.random.PRNGKey(0)
    k_x, k_t, k_w1, k_b1, k_w2, k_b2 = jax.random.split(key, 6)

    # Inputs (PyTorch NCHW convention): B=2, C=4, H=W=16
    x = jax.random.normal(k_x, (2, 4, 16, 16), dtype=jnp.float32)
    target = jax.random.normal(k_t, (2, 4, 16, 16), dtype=jnp.float32)

    # Synthetic "model" parameters (the PyTorch module only uses
    # model.parameters() for the L2 penalty, so any shapes work):
    params = [
        jax.random.normal(k_w1, (4, 4, 3, 3), dtype=jnp.float32) * 0.1,
        jax.random.normal(k_b1, (4,), dtype=jnp.float32) * 0.1,
        jax.random.normal(k_w2, (32, 16), dtype=jnp.float32) * 0.1,
        jax.random.normal(k_b2, (32,), dtype=jnp.float32) * 0.1,
    ]

    lam = 0.01
    loss = l2_reg_loss(x, target, params, lam=lam)
    loss = jax.block_until_ready(loss)

    # Pure-JAX reference check.
    ref_mse = jnp.mean((x - target) ** 2)
    ref_l2 = sum(jnp.sum(p ** 2) for p in params)
    ref = ref_mse + lam * ref_l2
    assert jnp.allclose(loss, ref, rtol=1e-5, atol=1e-5), (loss, ref)

    print("KERNEL_OK")
</pallas_src>

<mosaic_0001>
module attributes {stable_mosaic.version = 11 : i64} {
  func.func @_fused_kernel(%arg0: i32, %arg1: memref<16x128xf32, #tpu.memory_space<vmem>>, %arg2: memref<16x128xf32, #tpu.memory_space<vmem>>, %arg3: memref<8x128xf32, #tpu.memory_space<vmem>>, %arg4: memref<1x2xf32, #tpu.memory_space<smem>>, %arg5: memref<16x128xf32, #tpu.memory_space<vmem>>, %arg6: memref<8x128xf32, #tpu.memory_space<vmem>>) attributes {dimension_semantics = [#tpu.dimension_semantics<arbitrary>], iteration_bounds = array<i64: 1>, scalar_prefetch = 0 : i64, scratch_operands = 2 : i64, tpu.core_type = #tpu.core_type<tc>, window_params = [{transform_indices = @transform_0, window_bounds = array<i64: 16, 128>}, {transform_indices = @transform_1, window_bounds = array<i64: 16, 128>}, {transform_indices = @transform_2, window_bounds = array<i64: 8, 128>}, {transform_indices = @transform_3, window_bounds = array<i64: 1, 2>}]} {
    %c0_i32 = arith.constant 0 : i32
    %0 = arith.cmpi eq, %arg0, %c0_i32 : i32
    %1 = arith.extui %0 : i1 to i32
    %c0_i32_0 = arith.constant 0 : i32
    %2 = arith.cmpi ne, %1, %c0_i32_0 : i32
    scf.if %2 {
      %cst = arith.constant 0.000000e+00 : f32
      %12 = vector.broadcast %cst : f32 to vector<16x128xf32>
      %c0 = arith.constant 0 : index
      %c0_6 = arith.constant 0 : index
      %13 = vector.load %arg5[%c0, %c0_6] : memref<16x128xf32, #tpu.memory_space<vmem>>, vector<16x128xf32>
      tpu.vector_store %arg5[%c0, %c0_6], %12 {strides = array<i32>} : memref<16x128xf32, #tpu.memory_space<vmem>>, vector<16x128xf32>,
      %cst_7 = arith.constant 0.000000e+00 : f32
      %14 = vector.broadcast %cst_7 : f32 to vector<8x128xf32>
      %c0_8 = arith.constant 0 : index
      %c0_9 = arith.constant 0 : index
      %15 = vector.load %arg6[%c0_8, %c0_9] : memref<8x128xf32, #tpu.memory_space<vmem>>, vector<8x128xf32>
      tpu.vector_store %arg6[%c0_8, %c0_9], %14 {strides = array<i32>} : memref<8x128xf32, #tpu.memory_space<vmem>>, vector<8x128xf32>,
    } else {
    }
    %c1_i32 = arith.constant 1 : i32
    %3 = arith.cmpi slt, %arg0, %c1_i32 : i32
    %4 = arith.extui %3 : i1 to i32
    %c0_i32_1 = arith.constant 0 : i32
    %5 = arith.cmpi ne, %4, %c0_i32_1 : i32
    scf.if %5 {
      %c0 = arith.constant 0 : index
      %c0_6 = arith.constant 0 : index
      %12 = vector.load %arg1[%c0, %c0_6] : memref<16x128xf32, #tpu.memory_space<vmem>>, vector<16x128xf32>
      %c0_7 = arith.constant 0 : index
      %c0_8 = arith.constant 0 : index
      %13 = vector.load %arg2[%c0_7, %c0_8] : memref<16x128xf32, #tpu.memory_space<vmem>>, vector<16x128xf32>
      %14 = arith.subf %12, %13 : vector<16x128xf32>
      %c0_9 = arith.constant 0 : index
      %c0_10 = arith.constant 0 : index
      %15 = vector.load %arg5[%c0_9, %c0_10] : memref<16x128xf32, #tpu.memory_space<vmem>>, vector<16x128xf32>
      %16 = arith.mulf %14, %14 : vector<16x128xf32>
      %17 = arith.addf %15, %16 : vector<16x128xf32>
      %c0_11 = arith.constant 0 : index
      %c0_12 = arith.constant 0 : index
      %18 = vector.load %arg5[%c0_11, %c0_12] : memref<16x128xf32, #tpu.memory_space<vmem>>, vector<16x128xf32>
      tpu.vector_store %arg5[%c0_11, %c0_12], %17 {strides = array<i32>} : memref<16x128xf32, #tpu.memory_space<vmem>>, vector<16x128xf32>,
    } else {
    }
    %c1_i32_2 = arith.constant 1 : i32
    %6 = arith.cmpi slt, %arg0, %c1_i32_2 : i32
    %7 = arith.extui %6 : i1 to i32
    %c0_i32_3 = arith.constant 0 : i32
    %8 = arith.cmpi ne, %7, %c0_i32_3 : i32
    scf.if %8 {
      %c0 = arith.constant 0 : index
      %c0_6 = arith.constant 0 : index
      %12 = vector.load %arg3[%c0, %c0_6] : memref<8x128xf32, #tpu.memory_space<vmem>>, vector<8x128xf32>
      %c0_7 = arith.constant 0 : index
      %c0_8 = arith.constant 0 : index
      %13 = vector.load %arg6[%c0_7, %c0_8] : memref<8x128xf32, #tpu.memory_space<vmem>>, vector<8x128xf32>
      %14 = arith.mulf %12, %12 : vector<8x128xf32>
      %15 = arith.addf %13, %14 : vector<8x128xf32>
      %c0_9 = arith.constant 0 : index
      %c0_10 = arith.constant 0 : index
      %16 = vector.load %arg6[%c0_9, %c0_10] : memref<8x128xf32, #tpu.memory_space<vmem>>, vector<8x128xf32>
      tpu.vector_store %arg6[%c0_9, %c0_10], %15 {strides = array<i32>} : memref<8x128xf32, #tpu.memory_space<vmem>>, vector<8x128xf32>,
    } else {
    }
    %c0_i32_4 = arith.constant 0 : i32
    %9 = arith.cmpi eq, %arg0, %c0_i32_4 : i32
    %10 = arith.extui %9 : i1 to i32
    %c0_i32_5 = arith.constant 0 : i32
    %11 = arith.cmpi ne, %10, %c0_i32_5 : i32
    scf.if %11 {
      %c0 = arith.constant 0 : index
      %c0_6 = arith.constant 0 : index
      %12 = vector.load %arg5[%c0, %c0_6] : memref<16x128xf32, #tpu.memory_space<vmem>>, vector<16x128xf32>
      %13 = vector.shape_cast %12 : vector<16x128xf32> to vector<1x16x128xf32>
      %cst = arith.constant dense<0.000000e+00> : vector<1xf32>
      %14 = vector.multi_reduction <add>, %13, %cst [1, 2] : vector<1x16x128xf32> to vector<1xf32>
      %15 = vector.shape_cast %14 : vector<1xf32> to vector<1x1x1xf32>
      %16 = vector.extract %15[0, 0, 0] : f32 from vector<1x1x1xf32>
      %c0_7 = arith.constant 0 : index
      %c0_8 = arith.constant 0 : index
      %17 = memref.load %arg4[%c0_7, %c0_8] : memref<1x2xf32, #tpu.memory_space<smem>>
      memref.store %16, %arg4[%c0_7, %c0_8] : memref<1x2xf32, #tpu.memory_space<smem>>
      %c0_9 = arith.constant 0 : index
      %c0_10 = arith.constant 0 : index
      %18 = vector.load %arg6[%c0_9, %c0_10] : memref<8x128xf32, #tpu.memory_space<vmem>>, vector<8x128xf32>
      %19 = vector.shape_cast %18 : vector<8x128xf32> to vector<1x8x128xf32>
      %cst_11 = arith.constant dense<0.000000e+00> : vector<1xf32>
      %20 = vector.multi_reduction <add>, %19, %cst_11 [1, 2] : vector<1x8x128xf32> to vector<1xf32>
      %21 = vector.shape_cast %20 : vector<1xf32> to vector<1x1x1xf32>
      %22 = vector.extract %21[0, 0, 0] : f32 from vector<1x1x1xf32>
      %c0_12 = arith.constant 0 : index
      %c1 = arith.constant 1 : index
      %23 = memref.load %arg4[%c0_12, %c1] : memref<1x2xf32, #tpu.memory_space<smem>>
      memref.store %22, %arg4[%c0_12, %c1] : memref<1x2xf32, #tpu.memory_space<smem>>
    } else {
    }
    return
  }
  func.func @transform_0(%arg0: i32) -> (i32, i32) {
    %c0_i32 = arith.constant 0 : i32
    %0 = arith.minsi %arg0, %c0_i32 : i32
    %c0_i32_0 = arith.constant 0 : i32
    %c0_i32_1 = arith.constant 0 : i32
    return %0, %c0_i32_0 : i32, i32
  }
  func.func @transform_1(%arg0: i32) -> (i32, i32) {
    %c0_i32 = arith.constant 0 : i32
    %0 = arith.minsi %arg0, %c0_i32 : i32
    %c0_i32_0 = arith.constant 0 : i32
    %c0_i32_1 = arith.constant 0 : i32
    return %0, %c0_i32_0 : i32, i32
  }
  func.func @transform_2(%arg0: i32) -> (i32, i32) {
    %c0_i32 = arith.constant 0 : i32
    %0 = arith.minsi %arg0, %c0_i32 : i32
    %c0_i32_0 = arith.constant 0 : i32
    %c0_i32_1 = arith.constant 0 : i32
    return %0, %c0_i32_0 : i32, i32
  }
  func.func @transform_3(%arg0: i32) -> (i32, i32) {
    %c0_i32 = arith.constant 0 : i32
    %c0_i32_0 = arith.constant 0 : i32
    %c0_i32_1 = arith.constant 0 : i32
    return %c0_i32, %c0_i32_0 : i32, i32
  }
}

</mosaic_0001>

<bundles_post_ra>
// kernel: _fused_sums.1
= control target key start
LH: loop header
LB: loop body
LE: loop exit
PB: predicated region body
PF: predicated region fallthrough
CT: control target
= control target key end

     0   :  { %8 = vsyncpa [#allocation5], 0  ;;  %s187_s0 = inlined_call_operand.vmem [shape: f32[16,128], index: 0, kind: input, shape index: {}]   ;;  %s188_s1 = inlined_call_operand.hbm [shape: f32[16,128], index: 1, kind: input, shape index: {}]   ;;  %s189_s2 = inlined_call_operand.vmem [shape: f32[8,128], index: 2, kind: input, shape index: {}]   ;;  %s190_s3 = inlined_call_operand.vmem [shape: f32[1,2], index: 3, kind: output, shape index: {}]  }
   0x1   :  { %9 = vsyncpa [#allocation6], 0  ;;  %s148_s12 = smov [#allocation4]  }
   0x2   :  { %s17_s13 = sshll.u32 %s148_s12, 4  ;;  %s18_s13 = int_to_ptr.vmem [resolvable:$true] %s17_s13 }
   0x3   :  { %s120_s14 = scalar_lea.vmem %s18_s13, 256  ;;  %p125_p1 = scmp.lt.s32.totalorder %s18_s13, %s18_s13 }
   0x4   :  { %p121_p0 = scmp.ne.s32.totalorder %s18_s13, %s120_s14  ;;  %p126_p2 = scmp.lt.s32.totalorder %s120_s14, %s120_s14 }
   0x6   :  { %p127_p3 = por %p126_p2, %p125_p1 }
   0x8   :  { %p128_p4 = pnand %p127_p3, %p121_p0 }
   0xa   :  { %131 = shalt.err (!%p128_p4)
}
   0xb   :  { %s149_s15 = smov 128   ;;  %s150_s16 = smov 8  }
   0xc   :  { %23 = dma.hbm_to_vmem [thread:$0]  %s188_s1, 256, %s18_s13, [#allocation5], %s149_s15, %s149_s15, %s150_s16  }
   0xd   :  { %144 = dma.done.wait [#allocation5], 256  }
   0xe   :  { %145 = vsyncadd [#allocation5], 4294967040  ;;  %v40_v0 = vld [vmem:[%s187_s0] sm:$0xff]  ;;  %v41_v1 = vld [vmem:[%s187_s0 + $0x8] sm:$0xff]  ;;  %s94_s25 = sshll.u32 %s190_s3, 4  ;;  %s95_s25 = int_to_ptr.vmem [resolvable:$true] %s94_s25 }
   0xf   :  { %v42_v2 = vld [vmem:[#allocation4] sm:$0xff]  ;;  %v43_v3 = vld [vmem:[#allocation4 + $0x8] sm:$0xff]  ;;  %s132_s27 = scalar_lea.vmem %s95_s25, 16  ;;  %p137_p6 = scmp.lt.s32.totalorder %s95_s25, %s95_s25 }
  0x10   :  { %v44_v4 = vsub.f32 %v40_v0, %v42_v2  ;;  %v45_v5 = vsub.f32 %v41_v1, %v43_v3  ;;  %v54_v8 = vld [vmem:[%s189_s2] sm:$0xff]  ;;  %p133_p5 = scmp.ne.s32.totalorder %s95_s25, %s132_s27  ;;  %p138_p7 = scmp.lt.s32.totalorder %s132_s27, %s132_s27 }
  0x11   :  { %v56_v10 = vmul.f32 %v54_v8, %v54_v8 }
  0x12   :  { %v48_v6 = vmul.f32 %v44_v4, %v44_v4  ;;  %v49_v7 = vmul.f32 %v45_v5, %v45_v5  ;;  %p139_p8 = por %p138_p7, %p137_p6 }
  0x14   :  { %v64_v9 = vadd.f32 %v49_v7, %v48_v6  ;;  %p140_p9 = pnand %p139_p8, %p133_p5 }
  0x16   :  { %65 = vadd.xlane.f32.xlu0 %v64_v9 }
  0x1a   :  { %77 = vadd.xlane.f32.xlu0 %v56_v10 }
  0x9f   :  { %v66_v11 = vpop.xlane.xlu0 %65 }
  0xa0   :  { %v67_v12 = vrot.slane %v66_v11, 4 }
  0xa2   :  { %v68_v13 = vadd.f32 %v67_v12, %v66_v11 }
  0xa3   :  { %v78_v14 = vpop.xlane.xlu0 %77 }
  0xa4   :  { %v69_v15 = vrot.slane %v68_v13, 2  ;;  %v79_v16 = vrot.slane %v78_v14, 4 }
  0xa6   :  { %v80_v17 = vadd.f32 %v79_v16, %v78_v14  ;;  %v70_v18 = vadd.f32 %v69_v15, %v68_v13 }
  0xa8   :  { %v81_v19 = vrot.slane %v80_v17, 2  ;;  %v71_v20 = vrot.slane %v70_v18, 1 }
  0xaa   :  { %v82_v21 = vadd.f32 %v81_v19, %v80_v17  ;;  %v72_v22 = vadd.f32 %v71_v20, %v70_v18 }
  0xac   :  { %104 = vpush %v72_v22  ;;  %v83_v23 = vrot.slane %v82_v21, 1 }
  0xae   :  { %v84_v24 = vadd.f32 %v83_v23, %v82_v21 }
  0xb0   :  { %106 = vpush %v84_v24 }
  0xdd   :  { %s105_s0 = spop %104 }
  0xde   :  { %75 = sst [smem:[#allocation7]] %s105_s0 }
  0xe1   :  { %s107_s26 = spop %106 }
  0xe2   :  { %87 = sst [smem:[#allocation7 + $0x1]] %s107_s26 }
  0xe3   :  { %143 = shalt.err (!%p140_p9)
}
  0xe4   :  { %s151_s28 = smov [#allocation7]  }
  0xe5   :  { %97 = dma.smem_to_vmem %s151_s28, 16, %s95_s25, [#allocation6]  }
  0xe6   :  { %146 = dma.done.wait [#allocation6], 16  }
  0xe7   :  { %147 = vsyncadd [#allocation6], 4294967280 }
  0xe8   :  { %101 = sfence }
  0xe9   :  { %102 = vsyncpa [#allocation5], 1 }
  0xea   :  { %103 = vsyncpa [#allocation6], 1 }

</bundles_post_ra>
